<compile_context>
chip_gen: v5e
topology: v5e:2x2
jax: 0.10.0
libtpu: 0.0.40
codegen_flags: <defaults>
</compile_context>

<pallas_src>
import functools

import numpy as np
import jax
import jax.numpy as jnp
from jax.experimental import pallas as pl
from jax.experimental.pallas import tpu as pltpu


# ----------------------------------------------------------------------------
# coif2 wavelet basis construction (plain numpy "glue"; mirrors
# _AltWaveletGenerator(N, target_length, wavelet_type='coif2'))
# ----------------------------------------------------------------------------
# pywt.Wavelet('coif2').rec_lo (reconstruction low-pass, 12 taps, sums to sqrt(2))
_COIF2_REC_LO = np.array(
    [0.016387336463522112, -0.041464936781759150, -0.067372554721963018,
     0.386110066821162220, 0.812723635445542270, 0.417005184421692540,
     -0.076488599078306393, -0.059434418646456898, 0.023680171946334084,
     0.005611434819394499, -0.001823208870702993, -0.000720549445364512],
    dtype=np.float64)


def _qmf(filt):
    """Quadrature mirror filter: reverse and negate odd taps."""
    qm = np.asarray(filt, dtype=np.float64)[::-1].copy()
    qm[1::2] = -qm[1::2]
    return qm


def _refine(coeffs, filt):
    """One two-scale refinement step: upsample by 2, convolve, scale by sqrt(2)."""
    up = np.zeros(2 * len(coeffs) - 1)
    up[::2] = coeffs
    return np.sqrt(2.0) * np.convolve(up, filt)


def _cascade(rec_lo, rec_hi, level):
    """Cascade approximation of (phi, psi) at resolution 2**-level."""
    phi = _refine(np.array([1.0]), rec_lo)
    psi = _refine(np.array([1.0]), rec_hi)
    for _ in range(level - 1):
        phi = _refine(phi, rec_lo)
        psi = _refine(psi, rec_lo)
    return phi, psi


def make_coif2_basis(basis_dim, target_length, level=10):
    """Builds the (basis_dim, target_length) basis of _AltWaveletGenerator('coif2')."""
    # TODO(synk): pywt.Wavelet('coif2').wavefun(level=10) is approximated with the
    # classic cascade algorithm (no pywt/scipy dependency); shapes/semantics match
    # the module, values may differ slightly from a pywt-based reference.
    rec_lo = _COIF2_REC_LO
    rec_hi = _qmf(rec_lo)
    phi, psi = _cascade(rec_lo, rec_hi, level)
    n = len(phi)
    x = np.linspace(0.0, float(len(rec_lo) - 1), n)        # coif2 support is [0, 11]
    new_x = np.linspace(x.min(), x.max(), basis_dim)
    new_phi = np.interp(new_x, x, phi)
    new_psi = np.interp(new_x, x, psi)

    W = np.zeros((basis_dim, target_length))
    for i in range(target_length):
        if i < target_length // 2:
            W[:, i] = np.roll(new_phi, i)[:basis_dim]
        else:
            W[:, i] = np.roll(new_psi, i - target_length // 2)[:basis_dim]
    return W.astype(np.float32)


# ----------------------------------------------------------------------------
# Pallas kernel: batch-on-lanes layout.  All values are (features, tile_b).
#   h^T = relu(W^T @ x^T + b^T) repeated 4x, then one fused head matmul whose
#   rows 0..Lb-1 are the backcast head and rows Lb.. are the forecast head.
# ----------------------------------------------------------------------------
def coif2_wavelet_kernel(x_ref, w1_ref, b_ref, w234_ref, wh_ref, bh_ref,
                         b_out_ref, f_out_ref, *, Lb):
    # fc1:  (units, Lb) @ (Lb, tile_b) -> (units, tile_b)
    h = jnp.dot(w1_ref[...], x_ref[...], preferred_element_type=jnp.float32)
    h = jnp.maximum(h + b_ref[0], 0.0)
    # fc2..fc4 (static unroll): (units, units) @ (units, tile_b)
    for i in range(3):
        h = jnp.dot(w234_ref[i], h, preferred_element_type=jnp.float32)
        h = jnp.maximum(h + b_ref[i + 1], 0.0)
    # fused backcast||forecast head (basis already folded into wh/bh):
    #   (Lb+Lf, units) @ (units, tile_b) -> (Lb+Lf, tile_b)
    out = jnp.dot(wh_ref[...], h, preferred_element_type=jnp.float32) + bh_ref[...]
    # Lb is a multiple of 8 here, so both slices stay sublane-tile aligned.
    b_out_ref[...] = out[:Lb].astype(b_out_ref.dtype)
    f_out_ref[...] = out[Lb:].astype(f_out_ref.dtype)


_MAX_TILE_B = 4096


def _pick_tile_b(B, max_tile=_MAX_TILE_B):
    """Few, large batch tiles.  tile_b is the lane (last) dim of every block, so
    it must divide B and (unless it equals B) be a multiple of 128."""
    if B <= max_tile:
        # One step for small batches (best for v5e/v6e single-TC); two
        # lane-aligned steps once the batch is large enough that megacore
        # sharding on v7x is worth ~0.35us of extra step overhead.
        if B >= 512 and (B // 2) % 128 == 0:
            return B // 2
        return B
    # Large batch: fewest steps such that each tile is a multiple of 128.
    start = -(-B // max_tile)
    for steps in range(start, B + 1):
        if B % steps == 0 and (B // steps) % 128 == 0:
            return B // steps
    return B  # fallback: single full-batch tile


# ----------------------------------------------------------------------------
# One-time parameter preparation: fold the constant wavelet basis into the head
# weights, fuse backcast/forecast heads, transpose everything for the
# batch-on-lanes kernel layout, and pack operands into fewer refs.
# ----------------------------------------------------------------------------
def prepare_params(p):
    hp = jax.lax.Precision.HIGHEST
    wb = jnp.dot(p["wbl"], p["basis_b"], precision=hp)    # (units, Lb)
    bb = jnp.dot(p["bbl"], p["basis_b"], precision=hp)    # (1, Lb)
    wf = jnp.dot(p["wfl"], p["basis_f"], precision=hp)    # (units, Lf)
    bf = jnp.dot(p["bfl"], p["basis_f"], precision=hp)    # (1, Lf)
    kp = {
        "Lb": int(p["basis_b"].shape[1]),
        "Lf": int(p["basis_f"].shape[1]),
        # transposed weights: y^T = W^T @ x^T
        "w1_t": jnp.asarray(p["w1"].T, jnp.float32),                       # (units, Lb)
        "w234_t": jnp.stack([p["w2"].T, p["w3"].T, p["w4"].T]),            # (3, units, units)
        "b1234": jnp.stack([p["b1"].T, p["b2"].T, p["b3"].T, p["b4"].T]),  # (4, units, 1)
        "wh_t": jnp.concatenate([wb, wf], axis=1).T,                       # (Lb+Lf, units)
        "bh": jnp.concatenate([bb, bf], axis=1).T,                         # (Lb+Lf, 1)
    }
    return kp


def coif2_wavelet_forward(x, kparams, *, tile_b=None):
    """x: (B, backcast_length) float32.  kparams: output of prepare_params()."""
    B, Lb = x.shape
    Lf = kparams["Lf"]
    assert Lb == kparams["Lb"]
    if tile_b is None:
        tile_b = _pick_tile_b(B)
    assert B % tile_b == 0

    x_t = x.T  # (Lb, B): one wrapper transpose so batch lands on lanes

    w1_t, b1234 = kparams["w1_t"], kparams["b1234"]
    w234_t, wh_t, bh = kparams["w234_t"], kparams["wh_t"], kparams["bh"]

    in_specs = [
        pl.BlockSpec((Lb, tile_b), lambda i: (0, i)),          # x^T tile
        pl.BlockSpec(w1_t.shape, lambda i: (0, 0)),            # (units, Lb)
        pl.BlockSpec(b1234.shape, lambda i: (0, 0, 0)),        # (4, units, 1)
        pl.BlockSpec(w234_t.shape, lambda i: (0, 0, 0)),       # (3, units, units)
        pl.BlockSpec(wh_t.shape, lambda i: (0, 0)),            # (Lb+Lf, units)
        pl.BlockSpec(bh.shape, lambda i: (0, 0)),              # (Lb+Lf, 1)
    ]
    out_specs = (
        pl.BlockSpec((Lb, tile_b), lambda i: (0, i)),          # backcast^T tile
        pl.BlockSpec((Lf, tile_b), lambda i: (0, i)),          # forecast^T tile
    )

    b_t, f_t = pl.pallas_call(
        functools.partial(coif2_wavelet_kernel, Lb=Lb),
        out_shape=(jax.ShapeDtypeStruct((Lb, B), jnp.float32),
                   jax.ShapeDtypeStruct((Lf, B), jnp.float32)),
        grid=(B // tile_b,),
        in_specs=in_specs,
        out_specs=out_specs,
        compiler_params=pltpu.CompilerParams(
            dimension_semantics=("parallel",)),
    )(x_t, w1_t, b1234, w234_t, wh_t, bh)

    # return module-shaped (B, Lb), (B, Lf); the two tiny transposes are the
    # only wrapper-side layout ops left on the forward path.
    return b_t.T, f_t.T


# ----------------------------------------------------------------------------
# Deterministic parameter initialization (shapes from the module's __init__)
# ----------------------------------------------------------------------------
def init_params(key, units, backcast_length, forecast_length, basis_dim,
                share_weights=False):
    ks = jax.random.split(key, 6)

    def lin(k, fan_in, fan_out):
        # PyTorch-style uniform(-1/sqrt(fan_in), 1/sqrt(fan_in)); stored transposed
        # as (in_features, out_features) so y = x @ W + b.
        bound = 1.0 / np.sqrt(fan_in)
        kw, kb = jax.random.split(k)
        w = jax.random.uniform(kw, (fan_in, fan_out), jnp.float32, -bound, bound)
        b = jax.random.uniform(kb, (1, fan_out), jnp.float32, -bound, bound)
        return w, b

    p = {}
    p["w1"], p["b1"] = lin(ks[0], backcast_length, units)
    p["w2"], p["b2"] = lin(ks[1], units, units)
    p["w3"], p["b3"] = lin(ks[2], units, units)
    p["w4"], p["b4"] = lin(ks[3], units, units)
    p["wbl"], p["bbl"] = lin(ks[4], units, basis_dim)
    if share_weights:
        p["wfl"], p["bfl"] = p["wbl"], p["bbl"]
    else:
        p["wfl"], p["bfl"] = lin(ks[5], units, basis_dim)
    p["basis_b"] = jnp.asarray(make_coif2_basis(basis_dim, backcast_length))
    p["basis_f"] = jnp.asarray(make_coif2_basis(basis_dim, forecast_length))
    return p


def reference_forward(x, p):
    """Plain-JAX fp32 reference matching the PyTorch forward semantics exactly
    (un-fused head/basis matmuls, HIGHEST precision so it is a true f32 oracle)."""
    hp = jax.lax.Precision.HIGHEST
    h = x
    for i in (1, 2, 3, 4):
        h = jnp.maximum(jnp.dot(h, p[f"w{i}"], precision=hp) + p[f"b{i}"], 0.0)
    b = jnp.dot(h, p["wbl"], precision=hp) + p["bbl"]
    f = jnp.dot(h, p["wfl"], precision=hp) + p["bfl"]
    b = jnp.dot(b, p["basis_b"], precision=hp)
    f = jnp.dot(f, p["basis_f"], precision=hp)
    return b, f


if __name__ == "__main__":
    units = 32
    backcast_length = 16
    forecast_length = 8
    basis_dim = 32
    batch = 64

    key = jax.random.PRNGKey(0)
    kx, kp = jax.random.split(key)
    x = jax.random.normal(kx, (batch, backcast_length), jnp.float32)
    params = init_params(kp, units, backcast_length, forecast_length, basis_dim)

    # one-time prep: fold basis into heads, transpose/pack for the kernel layout
    kernel_params = prepare_params(params)
    kernel_params = jax.block_until_ready(kernel_params)

    b_out, f_out = coif2_wavelet_forward(x, kernel_params)
    b_out, f_out = jax.block_until_ready((b_out, f_out))

    b_ref, f_ref = reference_forward(x, params)
    assert b_out.shape == (batch, backcast_length)
    assert f_out.shape == (batch, forecast_length)
    np.testing.assert_allclose(np.asarray(b_out), np.asarray(b_ref),
                               rtol=1e-3, atol=1e-3)
    np.testing.assert_allclose(np.asarray(f_out), np.asarray(f_ref),
                               rtol=1e-3, atol=1e-3)
    print("KERNEL_OK")
</pallas_src>

<mosaic_0001>
module attributes {stable_mosaic.version = 11 : i64} {
  func.func @coif2_wavelet_kernel(%arg0: i32, %arg1: memref<16x64xf32, #tpu.memory_space<vmem>>, %arg2: memref<32x16xf32, #tpu.memory_space<vmem>>, %arg3: memref<4x32x1xf32, #tpu.memory_space<vmem>>, %arg4: memref<3x32x32xf32, #tpu.memory_space<vmem>>, %arg5: memref<24x32xf32, #tpu.memory_space<vmem>>, %arg6: memref<24x1xf32, #tpu.memory_space<vmem>>, %arg7: memref<16x64xf32, #tpu.memory_space<vmem>>, %arg8: memref<8x64xf32, #tpu.memory_space<vmem>>) attributes {dimension_semantics = [#tpu.dimension_semantics<parallel>], iteration_bounds = array<i64: 1>, scalar_prefetch = 0 : i64, scratch_operands = 0 : i64, tpu.core_type = #tpu.core_type<tc>, window_params = [{transform_indices = @transform_0, window_bounds = array<i64: 16, 64>}, {pipeline_mode = #tpu.pipeline_mode<synchronous>, transform_indices = @transform_1, window_bounds = array<i64: 32, 16>}, {pipeline_mode = #tpu.pipeline_mode<synchronous>, transform_indices = @transform_2, window_bounds = array<i64: 4, 32, 1>}, {pipeline_mode = #tpu.pipeline_mode<synchronous>, transform_indices = @transform_3, window_bounds = array<i64: 3, 32, 32>}, {pipeline_mode = #tpu.pipeline_mode<synchronous>, transform_indices = @transform_4, window_bounds = array<i64: 24, 32>}, {pipeline_mode = #tpu.pipeline_mode<synchronous>, transform_indices = @transform_5, window_bounds = array<i64: 24, 1>}, {transform_indices = @transform_6, window_bounds = array<i64: 16, 64>}, {transform_indices = @transform_7, window_bounds = array<i64: 8, 64>}]} {
    %c0 = arith.constant 0 : index
    %c0_0 = arith.constant 0 : index
    %0 = vector.load %arg2[%c0, %c0_0] : memref<32x16xf32, #tpu.memory_space<vmem>>, vector<32x16xf32>
    %c0_1 = arith.constant 0 : index
    %c0_2 = arith.constant 0 : index
    %1 = vector.load %arg1[%c0_1, %c0_2] : memref<16x64xf32, #tpu.memory_space<vmem>>, vector<16x64xf32>
    %cst = arith.constant dense<0.000000e+00> : vector<32x64xf32>
    %2 = tpu.matmul %0, %1, %cst {dimension_numbers = #tpu.dot_dimension_numbers<[1], [0], [0], [1], [0, 0, 1, 1], [], []>} : vector<32x16xf32>, vector<16x64xf32>, vector<32x64xf32> -> vector<32x64xf32>
    %c0_3 = arith.constant 0 : index
    %c0_4 = arith.constant 0 : index
    %c0_5 = arith.constant 0 : index
    %3 = vector.load %arg3[%c0_3, %c0_4, %c0_5] : memref<4x32x1xf32, #tpu.memory_space<vmem>>, vector<1x32x1xf32>
    %4 = vector.shape_cast %3 : vector<1x32x1xf32> to vector<32x1xf32>
    %5 = vector.broadcast %4 : vector<32x1xf32> to vector<32x64xf32>
    %6 = arith.addf %2, %5 : vector<32x64xf32>
    %cst_6 = arith.constant 0.000000e+00 : f32
    %7 = vector.broadcast %cst_6 : f32 to vector<32x64xf32>
    %8 = arith.maximumf %6, %7 : vector<32x64xf32>
    %c0_7 = arith.constant 0 : index
    %c0_8 = arith.constant 0 : index
    %c0_9 = arith.constant 0 : index
    %9 = vector.load %arg4[%c0_7, %c0_8, %c0_9] : memref<3x32x32xf32, #tpu.memory_space<vmem>>, vector<1x32x32xf32>
    %10 = vector.shape_cast %9 : vector<1x32x32xf32> to vector<32x32xf32>
    %cst_10 = arith.constant dense<0.000000e+00> : vector<32x64xf32>
    %11 = tpu.matmul %10, %8, %cst_10 {dimension_numbers = #tpu.dot_dimension_numbers<[1], [0], [0], [1], [0, 0, 1, 1], [], []>} : vector<32x32xf32>, vector<32x64xf32>, vector<32x64xf32> -> vector<32x64xf32>
    %c1 = arith.constant 1 : index
    %c0_11 = arith.constant 0 : index
    %c0_12 = arith.constant 0 : index
    %12 = vector.load %arg3[%c1, %c0_11, %c0_12] : memref<4x32x1xf32, #tpu.memory_space<vmem>>, vector<1x32x1xf32>
    %13 = vector.shape_cast %12 : vector<1x32x1xf32> to vector<32x1xf32>
    %14 = vector.broadcast %13 : vector<32x1xf32> to vector<32x64xf32>
    %15 = arith.addf %11, %14 : vector<32x64xf32>
    %cst_13 = arith.constant 0.000000e+00 : f32
    %16 = vector.broadcast %cst_13 : f32 to vector<32x64xf32>
    %17 = arith.maximumf %15, %16 : vector<32x64xf32>
    %c1_14 = arith.constant 1 : index
    %c0_15 = arith.constant 0 : index
    %c0_16 = arith.constant 0 : index
    %18 = vector.load %arg4[%c1_14, %c0_15, %c0_16] : memref<3x32x32xf32, #tpu.memory_space<vmem>>, vector<1x32x32xf32>
    %19 = vector.shape_cast %18 : vector<1x32x32xf32> to vector<32x32xf32>
    %cst_17 = arith.constant dense<0.000000e+00> : vector<32x64xf32>
    %20 = tpu.matmul %19, %17, %cst_17 {dimension_numbers = #tpu.dot_dimension_numbers<[1], [0], [0], [1], [0, 0, 1, 1], [], []>} : vector<32x32xf32>, vector<32x64xf32>, vector<32x64xf32> -> vector<32x64xf32>
    %c2 = arith.constant 2 : index
    %c0_18 = arith.constant 0 : index
    %c0_19 = arith.constant 0 : index
    %21 = vector.load %arg3[%c2, %c0_18, %c0_19] : memref<4x32x1xf32, #tpu.memory_space<vmem>>, vector<1x32x1xf32>
    %22 = vector.shape_cast %21 : vector<1x32x1xf32> to vector<32x1xf32>
    %23 = vector.broadcast %22 : vector<32x1xf32> to vector<32x64xf32>
    %24 = arith.addf %20, %23 : vector<32x64xf32>
    %cst_20 = arith.constant 0.000000e+00 : f32
    %25 = vector.broadcast %cst_20 : f32 to vector<32x64xf32>
    %26 = arith.maximumf %24, %25 : vector<32x64xf32>
    %c2_21 = arith.constant 2 : index
    %c0_22 = arith.constant 0 : index
    %c0_23 = arith.constant 0 : index
    %27 = vector.load %arg4[%c2_21, %c0_22, %c0_23] : memref<3x32x32xf32, #tpu.memory_space<vmem>>, vector<1x32x32xf32>
    %28 = vector.shape_cast %27 : vector<1x32x32xf32> to vector<32x32xf32>
    %cst_24 = arith.constant dense<0.000000e+00> : vector<32x64xf32>
    %29 = tpu.matmul %28, %26, %cst_24 {dimension_numbers = #tpu.dot_dimension_numbers<[1], [0], [0], [1], [0, 0, 1, 1], [], []>} : vector<32x32xf32>, vector<32x64xf32>, vector<32x64xf32> -> vector<32x64xf32>
    %c3 = arith.constant 3 : index
    %c0_25 = arith.constant 0 : index
    %c0_26 = arith.constant 0 : index
    %30 = vector.load %arg3[%c3, %c0_25, %c0_26] : memref<4x32x1xf32, #tpu.memory_space<vmem>>, vector<1x32x1xf32>
    %31 = vector.shape_cast %30 : vector<1x32x1xf32> to vector<32x1xf32>
    %32 = vector.broadcast %31 : vector<32x1xf32> to vector<32x64xf32>
    %33 = arith.addf %29, %32 : vector<32x64xf32>
    %cst_27 = arith.constant 0.000000e+00 : f32
    %34 = vector.broadcast %cst_27 : f32 to vector<32x64xf32>
    %35 = arith.maximumf %33, %34 : vector<32x64xf32>
    %c0_28 = arith.constant 0 : index
    %c0_29 = arith.constant 0 : index
    %36 = vector.load %arg5[%c0_28, %c0_29] : memref<24x32xf32, #tpu.memory_space<vmem>>, vector<24x32xf32>
    %cst_30 = arith.constant dense<0.000000e+00> : vector<24x64xf32>
    %37 = tpu.matmul %36, %35, %cst_30 {dimension_numbers = #tpu.dot_dimension_numbers<[1], [0], [0], [1], [0, 0, 1, 1], [], []>} : vector<24x32xf32>, vector<32x64xf32>, vector<24x64xf32> -> vector<24x64xf32>
    %c0_31 = arith.constant 0 : index
    %c0_32 = arith.constant 0 : index
    %38 = vector.load %arg6[%c0_31, %c0_32] : memref<24x1xf32, #tpu.memory_space<vmem>>, vector<24x1xf32>
    %39 = vector.broadcast %38 : vector<24x1xf32> to vector<24x64xf32>
    %40 = arith.addf %37, %39 : vector<24x64xf32>
    %41 = vector.extract_strided_slice %40 {offsets = [0, 0], sizes = [16, 64], strides = [1, 1]} : vector<24x64xf32> to vector<16x64xf32>
    %c0_33 = arith.constant 0 : index
    %c0_34 = arith.constant 0 : index
    %42 = vector.load %arg7[%c0_33, %c0_34] : memref<16x64xf32, #tpu.memory_space<vmem>>, vector<16x64xf32>
    tpu.vector_store %arg7[%c0_33, %c0_34], %41 {strides = array<i32>} : memref<16x64xf32, #tpu.memory_space<vmem>>, vector<16x64xf32>,
    %43 = vector.extract_strided_slice %40 {offsets = [16, 0], sizes = [8, 64], strides = [1, 1]} : vector<24x64xf32> to vector<8x64xf32>
    %c0_35 = arith.constant 0 : index
    %c0_36 = arith.constant 0 : index
    %44 = vector.load %arg8[%c0_35, %c0_36] : memref<8x64xf32, #tpu.memory_space<vmem>>, vector<8x64xf32>
    tpu.vector_store %arg8[%c0_35, %c0_36], %43 {strides = array<i32>} : memref<8x64xf32, #tpu.memory_space<vmem>>, vector<8x64xf32>,
    return
  }
  func.func @transform_0(%arg0: i32) -> (i32, i32) {
    %c0_i32 = arith.constant 0 : i32
    %c0_i32_0 = arith.constant 0 : i32
    return %c0_i32, %arg0 : i32, i32
  }
  func.func @transform_1(%arg0: i32) -> (i32, i32) {
    %c0_i32 = arith.constant 0 : i32
    %c0_i32_0 = arith.constant 0 : i32
    %c0_i32_1 = arith.constant 0 : i32
    return %c0_i32, %c0_i32_0 : i32, i32
  }
  func.func @transform_2(%arg0: i32) -> (i32, i32, i32) {
    %c0_i32 = arith.constant 0 : i32
    %c0_i32_0 = arith.constant 0 : i32
    %c0_i32_1 = arith.constant 0 : i32
    %c0_i32_2 = arith.constant 0 : i32
    return %c0_i32, %c0_i32_0, %c0_i32_1 : i32, i32, i32
  }
  func.func @transform_3(%arg0: i32) -> (i32, i32, i32) {
    %c0_i32 = arith.constant 0 : i32
    %c0_i32_0 = arith.constant 0 : i32
    %c0_i32_1 = arith.constant 0 : i32
    %c0_i32_2 = arith.constant 0 : i32
    return %c0_i32, %c0_i32_0, %c0_i32_1 : i32, i32, i32
  }
  func.func @transform_4(%arg0: i32) -> (i32, i32) {
    %c0_i32 = arith.constant 0 : i32
    %c0_i32_0 = arith.constant 0 : i32
    %c0_i32_1 = arith.constant 0 : i32
    return %c0_i32, %c0_i32_0 : i32, i32
  }
  func.func @transform_5(%arg0: i32) -> (i32, i32) {
    %c0_i32 = arith.constant 0 : i32
    %c0_i32_0 = arith.constant 0 : i32
    %c0_i32_1 = arith.constant 0 : i32
    return %c0_i32, %c0_i32_0 : i32, i32
  }
  func.func @transform_6(%arg0: i32) -> (i32, i32) {
    %c0_i32 = arith.constant 0 : i32
    %c0_i32_0 = arith.constant 0 : i32
    return %c0_i32, %arg0 : i32, i32
  }
  func.func @transform_7(%arg0: i32) -> (i32, i32) {
    %c0_i32 = arith.constant 0 : i32
    %c0_i32_0 = arith.constant 0 : i32
    return %c0_i32, %arg0 : i32, i32
  }
}

</mosaic_0001>

<bundles_post_ra>
// kernel: tpu_custom_call.1
= control target key start
LH: loop header
LB: loop body
LE: loop exit
PB: predicated region body
PF: predicated region fallthrough
CT: control target
= control target key end

     0   :  { %13 = vsyncpa [#allocation3], 0  ;;  %v525_v2 = vmov 0   ;;  %vm57_vm0 = vcmask 130048   ;;  %s718_s0 = inlined_call_operand.vmem [shape: f32[16,64], index: 0, kind: input, shape index: {}]   ;;  %s719_s1 = inlined_call_operand.vmem [shape: f32[32,16], index: 1, kind: input, shape index: {}]   ;;  %s720_s2 = inlined_call_operand.vmem [shape: f32[4,32,1], index: 2, kind: input, shape index: {}]   ;;  %s721_s3 = inlined_call_operand.vmem [shape: f32[3,32,32], index: 3, kind: input, shape index: {}]   ;;  %s722_s4 = inlined_call_operand.vmem [shape: f32[24,32], index: 4, kind: input, shape index: {}]   ;;  %s723_s5 = inlined_call_operand.vmem [shape: f32[24,1], index: 5, kind: input, shape index: {}]   ;;  %s724_s6 = inlined_call_operand.hbm [shape: f32[16,64], index: 6, kind: output, shape index: {0}]   ;;  %s725_s7 = inlined_call_operand.hbm [shape: f32[8,64], index: 7, kind: output, shape index: {1}]  }
   0x1   :  { %v32_v0 = vld [vmem:[%s718_s0 + $0x8] sm:$0xff]  ;;  %v36_v1 = vld [vmem:[%s720_s2 + $0x18] sm:$0xff]  ;;  %471 = vset.pattern.permute.xlu1 %v525_v2  ;;  %470 = vset.pattern.permute.xlu0 %v525_v2  ;;  %v31_v4 = vld [vmem:[%s718_s0] sm:$0xff] }
   0x2   :  { %v34_v3 = vld [vmem:[%s720_s2 + $0x8] sm:$0xff]  ;;  %84 = vmatpush.msra.mxu0 %v32_v0  ;;  %461 = vmatpush.msra.mxu1 %v32_v0  ;;  %v27_v5 = vld [vmem:[%s719_s1] sm:$0xff]  ;;  %v29_v6 = vld [vmem:[%s719_s1 + $0x10] sm:$0xff] }
   0x3   :  { %462 = vmatpush.msra.mxu2 %v32_v0  ;;  %54 = vperm.xlu0 %470, %v36_v1   ;;  %v30_v7 = vld [vmem:[%s719_s1 + $0x18] sm:$0xff] }
   0x4   :  { %44 = vperm.xlu1 %471, %v34_v3   ;;  %85 = vmatpush.msra.mxu0 %v31_v4 }
   0x5   :  { %463 = vmatpush.msra.mxu1 %v31_v4  ;;  %464 = vmatpush.msra.mxu2 %v31_v4 }
   0x6   :  { %14 = vsyncpa [#allocation5], 0  ;;  %422 = vmatmul.msk.f32.vlgmr.msra.gmra.mxu0 %vm57_vm0, %v27_v5  ;;  %424 = vmatmul.msk.f32.vlgmr.msra.gmra.mxu1 %vm57_vm0, %v29_v6  ;;  %v35_v8 = vld [vmem:[%s720_s2 + $0x10] sm:$0xff]  ;;  %v33_v9 = vld [vmem:[%s720_s2] sm:$0xff]  ;;  %vm132_vm1 = vcmask 261120   ;;  %vm384_vm2 = vcmask 523264  }
   0x7   :  { %425 = vmatmul.msk.f32.vlgmr.msra.gmra.mxu2 %vm57_vm0, %v30_v7  ;;  %472 = vset.pattern.permute.xlu2 %v525_v2  ;;  %v28_v10 = vld [vmem:[%s719_s1 + $0x8] sm:$0xff]  ;;  %v426_v12 = vld [vmem:[%s720_s2 + $0x20] sm:$0xff]  ;;  %v440_v13 = vld [vmem:[%s720_s2 + $0x50] sm:$0xff]  ;;  %s526_s27 = smov [#allocation2]   ;;  %s394_s30 = sshll.u32 %s724_s6, 4  ;;  %s395_s30 = int_to_ptr.hbm [resolvable:$true] %s394_s30 }
   0x8   :  { %v427_v11 = vld [vmem:[%s720_s2 + $0x28] sm:$0xff]  ;;  %v453_v15 = vld [vmem:[%s720_s2 + $0x78] sm:$0xff]  ;;  %v452_v16 = vld [vmem:[%s720_s2 + $0x70] sm:$0xff]  ;;  %s392_s1 = sshll.u32 %s526_s27, 4  ;;  %s528_s8 = smov 8   ;;  %s393_s1 = int_to_ptr.vmem [resolvable:$true] %s392_s1 }
   0x9   :  { %v439_v14 = vld [vmem:[%s720_s2 + $0x48] sm:$0xff]  ;;  %v450_v17 = vld [vmem:[%s720_s2 + $0x60] sm:$0xff]  ;;  %v333_v19 = vld [vmem:[%s723_s5 + $0x10] sm:$0xff]  ;;  %s408_s11 = sshll.u32 %s725_s7, 4  ;;  %s409_s11 = int_to_ptr.hbm [resolvable:$true] %s408_s11 }
   0xa   :  { %v331_v18 = vld [vmem:[%s723_s5] sm:$0xff]  ;;  %v429_v20 = vld [vmem:[%s720_s2 + $0x38] sm:$0xff]  ;;  %v428_v24 = vld [vmem:[%s720_s2 + $0x30] sm:$0xff] }
   0xb   :  { %49 = vperm.xlu0 %470, %v35_v8   ;;  %129 = vperm.xlu2 %472, %v429_v20   ;;  %v441_v34 = vld [vmem:[%s720_s2 + $0x58] sm:$0xff]  ;;  %v103_v39 = vld [vmem:[%s721_s3] sm:$0xff]  ;;  %v104_v41 = vld [vmem:[%s721_s3 + $0x8] sm:$0xff] }
   0xc   :  { %39 = vperm.xlu1 %471, %v33_v9   ;;  %v438_v40 = vld [vmem:[%s720_s2 + $0x40] sm:$0xff]  ;;  %v451_v42 = vld [vmem:[%s720_s2 + $0x68] sm:$0xff]  ;;  %v105_v43 = vld [vmem:[%s721_s3 + $0x10] sm:$0xff]  ;;  %s529_s2 = smov [#allocation4]  }
   0xd   :  { %v332_v44 = vld [vmem:[%s723_s5 + $0x8] sm:$0xff]  ;;  %v106_v45 = vld [vmem:[%s721_s3 + $0x18] sm:$0xff]  ;;  %v434_v62 = vld [vmem:[%s721_s3 + $0x20] sm:$0xff]  ;;  %s406_s5 = sshll.u32 %s529_s2, 4  ;;  %s407_s5 = int_to_ptr.vmem [resolvable:$true] %s406_s5 }
   0xe   :  { %423 = vmatmul.msk.f32.gmra.mxu0 %vm57_vm0, %v28_v10  ;;  %v435_v63 = vld [vmem:[%s721_s3 + $0x28] sm:$0xff]  ;;  %v436_v0 = vld [vmem:[%s721_s3 + $0x30] sm:$0xff]  ;;  %v437_v1 = vld [vmem:[%s721_s3 + $0x38] sm:$0xff] }
   0xf   :  { %v448_v20 = vld [vmem:[%s721_s3 + $0x50] sm:$0xff] }
  0x13   :  { %119 = vperm.xlu0 %470, %v427_v11   ;;  %124 = vperm.xlu2 %472, %v428_v24  }
  0x14   :  { %114 = vperm.xlu1 %471, %v426_v12  }
  0x1b   :  { %200 = vperm.xlu0 %470, %v440_v13   ;;  %205 = vperm.xlu2 %472, %v441_v34  }
  0x1c   :  { %195 = vperm.xlu1 %471, %v439_v14  }
  0x23   :  { %280 = vperm.xlu0 %470, %v453_v15   ;;  %190 = vperm.xlu2 %472, %v438_v40   ;;  %v330_v40 = vld [vmem:[%s722_s4 + $0x10] sm:$0xff] }
  0x24   :  { %275 = vperm.xlu1 %471, %v452_v16  }
  0x2b   :  { %265 = vperm.xlu0 %470, %v450_v17   ;;  %270 = vperm.xlu2 %472, %v451_v42  }
  0x2c   :  { %336 = vperm.xlu1 %471, %v331_v18   ;;  %v446_v18 = vld [vmem:[%s721_s3 + $0x40] sm:$0xff] }
  0x33   :  { %346 = vperm.xlu0 %470, %v333_v19   ;;  %341 = vperm.xlu2 %472, %v332_v44   ;;  %v447_v19 = vld [vmem:[%s721_s3 + $0x48] sm:$0xff] }
  0x65   :  { %v130_v48 = vpop.permute.xlu2 %129 }
  0x6d   :  { %v125_v50 = vpop.permute.xlu2 %124 }
  0x75   :  { %v55_v21 = vpop.permute.xlu0 %54  ;;  %v206_v5 = vpop.permute.xlu2 %205 }
  0x76   :  { %v45_v23 = vpop.permute.xlu1 %44 }
  0x7d   :  { %v50_v26 = vpop.permute.xlu0 %49  ;;  %v191_v13 = vpop.permute.xlu2 %190 }
  0x7e   :  { %v40_v33 = vpop.permute.xlu1 %39 }
  0x83   :  { %v87_v22 = vpop.f32.mrf.mxu0  ;;  %v93_v25 = vpop.f32.mrf.mxu1 }
  0x84   :  { %v94_v28 = vadd.f32 %v93_v25, %v50_v26  ;;  %v88_v35 = vadd.f32 %v87_v22, %v40_v33 }
  0x85   :  { %v120_v54 = vpop.permute.xlu0 %119 }
  0x86   :  { %v101_v36 = vmax.f32 %v94_v28, 0.0  ;;  %v99_v38 = vmax.f32 %v88_v35, 0.0  ;;  %v115_v57 = vpop.permute.xlu1 %114 }
  0x8a   :  { %v96_v27 = vpop.f32.mrf.mxu2 }
  0x8b   :  { %v97_v29 = vadd.f32 %v96_v27, %v55_v21  ;;  %v90_v30 = vpop.f32.mrf.mxu0  ;;  %v449_v21 = vld [vmem:[%s721_s3 + $0x58] sm:$0xff] }
  0x8c   :  { %v91_v32 = vadd.f32 %v90_v30, %v45_v23  ;;  %v271_v30 = vpop.permute.xlu2 %270 }
  0x8d   :  { %v102_v31 = vmax.f32 %v97_v29, 0.0  ;;  %v201_v6 = vpop.permute.xlu0 %200 }
  0x8e   :  { %v100_v37 = vmax.f32 %v91_v32, 0.0  ;;  %v196_v10 = vpop.permute.xlu1 %195 }
  0x8f   :  { %157 = vmatpush.msrb.mxu1 %v102_v31 }
  0x91   :  { %158 = vmatpush.msrb.mxu1 %v101_v36 }
  0x93   :  { %159 = vmatpush.msrb.mxu1 %v100_v37 }
  0x94   :  { %v342_v44 = vpop.permute.xlu2 %341 }
  0x95   :  { %160 = vmatpush.msrb.mxu1 %v99_v38  ;;  %v281_v25 = vpop.permute.xlu0 %280  ;;  %v328_v38 = vld [vmem:[%s722_s4] sm:$0xff] }
  0x96   :  { %430 = vmatmul.msk.f32.vlgmr.msrb.gmra.mxu1 %vm132_vm1, %v103_v39  ;;  %v276_v26 = vpop.permute.xlu1 %275  ;;  %v329_v39 = vld [vmem:[%s722_s4 + $0x8] sm:$0xff]  ;;  %s527_s4 = smov 128  }
  0x9d   :  { %v266_v33 = vpop.permute.xlu0 %265 }
  0x9e   :  { %431 = vmatmul.msk.f32.gmra.mxu1 %vm132_vm1, %v104_v41  ;;  %v337_v41 = vpop.permute.xlu1 %336 }
  0xa6   :  { %432 = vmatmul.msk.f32.gmra.mxu1 %vm132_vm1, %v105_v43 }
  0xae   :  { %433 = vmatmul.msk.f32.gmra.mxu1 %vm132_vm1, %v106_v45 }
 0x113   :  { %v162_v46 = vpop.f32.mrf.mxu1 }
 0x114   :  { %v163_v58 = vadd.f32 %v162_v46, %v115_v57 }
 0x116   :  { %v174_v61 = vmax.f32 %v163_v58, 0.0 }
 0x11b   :  { %v165_v47 = vpop.f32.mrf.mxu1 }
 0x11c   :  { %v166_v55 = vadd.f32 %v165_v47, %v120_v54  ;;  %v347_v47 = vpop.permute.xlu0 %346 }
 0x11e   :  { %v175_v60 = vmax.f32 %v166_v55, 0.0 }
 0x123   :  { %v168_v49 = vpop.f32.mrf.mxu1 }
 0x124   :  { %v169_v52 = vadd.f32 %v168_v49, %v125_v50 }
 0x126   :  { %v176_v59 = vmax.f32 %v169_v52, 0.0 }
 0x12b   :  { %v171_v51 = vpop.f32.mrf.mxu1 }
 0x12c   :  { %v172_v53 = vadd.f32 %v171_v51, %v130_v48 }
 0x12e   :  { %v177_v56 = vmax.f32 %v172_v53, 0.0 }
 0x130   :  { %232 = vmatpush.msrb.mxu2 %v177_v56 }
 0x132   :  { %233 = vmatpush.msrb.mxu2 %v176_v59 }
 0x134   :  { %234 = vmatpush.msrb.mxu2 %v175_v60 }
 0x136   :  { %235 = vmatpush.msrb.mxu2 %v174_v61 }
 0x137   :  { %442 = vmatmul.msk.f32.vlgmr.msrb.gmra.mxu2 %vm132_vm1, %v434_v62 }
 0x13f   :  { %443 = vmatmul.msk.f32.gmra.mxu2 %vm132_vm1, %v435_v63 }
 0x147   :  { %444 = vmatmul.msk.f32.gmra.mxu2 %vm132_vm1, %v436_v0 }
 0x14f   :  { %445 = vmatmul.msk.f32.gmra.mxu2 %vm132_vm1, %v437_v1 }
 0x1ba   :  { %v237_v2 = vpop.f32.mrf.mxu2 }
 0x1bb   :  { %v238_v14 = vadd.f32 %v237_v2, %v191_v13 }
 0x1bd   :  { %v249_v17 = vmax.f32 %v238_v14, 0.0 }
 0x1c2   :  { %v240_v3 = vpop.f32.mrf.mxu2 }
 0x1c3   :  { %v241_v11 = vadd.f32 %v240_v3, %v196_v10 }
 0x1c5   :  { %v250_v16 = vmax.f32 %v241_v11, 0.0 }
 0x1ca   :  { %v243_v4 = vpop.f32.mrf.mxu2 }
 0x1cb   :  { %v244_v8 = vadd.f32 %v243_v4, %v201_v6 }
 0x1cd   :  { %v251_v15 = vmax.f32 %v244_v8, 0.0 }
 0x1d2   :  { %v246_v7 = vpop.f32.mrf.mxu2 }
 0x1d3   :  { %v247_v9 = vadd.f32 %v246_v7, %v206_v5 }
 0x1d5   :  { %v252_v12 = vmax.f32 %v247_v9, 0.0 }
 0x1d7   :  { %307 = vmatpush.msra.mxu3 %v252_v12 }
 0x1d9   :  { %308 = vmatpush.msra.mxu3 %v251_v15 }
 0x1db   :  { %309 = vmatpush.msra.mxu3 %v250_v16 }
 0x1dd   :  { %310 = vmatpush.msra.mxu3 %v249_v17 }
 0x1de   :  { %454 = vmatmul.msk.f32.vlgmr.msra.gmra.mxu3 %vm132_vm1, %v446_v18 }
 0x1e6   :  { %455 = vmatmul.msk.f32.gmra.mxu3 %vm132_vm1, %v447_v19 }
 0x1ee   :  { %456 = vmatmul.msk.f32.gmra.mxu3 %vm132_vm1, %v448_v20 }
 0x1f6   :  { %457 = vmatmul.msk.f32.gmra.mxu3 %vm132_vm1, %v449_v21 }
 0x261   :  { %v312_v22 = vpop.f32.mrf.mxu3 }
 0x262   :  { %v313_v34 = vadd.f32 %v312_v22, %v266_v33 }
 0x264   :  { %v324_v37 = vmax.f32 %v313_v34, 0.0 }
 0x269   :  { %v315_v23 = vpop.f32.mrf.mxu3 }
 0x26a   :  { %v316_v31 = vadd.f32 %v315_v23, %v271_v30 }
 0x26c   :  { %v325_v36 = vmax.f32 %v316_v31, 0.0 }
 0x271   :  { %v318_v24 = vpop.f32.mrf.mxu3 }
 0x272   :  { %v319_v28 = vadd.f32 %v318_v24, %v276_v26 }
 0x274   :  { %v326_v35 = vmax.f32 %v319_v28, 0.0 }
 0x279   :  { %v321_v27 = vpop.f32.mrf.mxu3 }
 0x27a   :  { %v322_v29 = vadd.f32 %v321_v27, %v281_v25 }
 0x27c   :  { %v327_v32 = vmax.f32 %v322_v29, 0.0 }
 0x27e   :  { %370 = vmatpush.msrb.mxu0 %v327_v32 }
 0x280   :  { %371 = vmatpush.msrb.mxu0 %v326_v35 }
 0x282   :  { %372 = vmatpush.msrb.mxu0 %v325_v36 }
 0x284   :  { %373 = vmatpush.msrb.mxu0 %v324_v37 }
 0x285   :  { %458 = vmatmul.msk.f32.vlgmr.msrb.gmra.mxu0 %vm132_vm1, %v328_v38 }
 0x28d   :  { %459 = vmatmul.msk.f32.gmra.mxu0 %vm132_vm1, %v329_v39 }
 0x295   :  { %460 = vmatmul.msk.f32.gmra.mxu0 %vm132_vm1, %v330_v40 }
 0x302   :  { %v375_v42 = vpop.f32.mrf.mxu0 }
 0x303   :  { %v376_v43 = vadd.f32 %v375_v42, %v337_v41 }
 0x305   :  { %385 = vst.msk [vmem:[#allocation2] sm:$0xff] %vm384_vm2, %v376_v43 }
 0x30a   :  { %v378_v45 = vpop.f32.mrf.mxu0 }
 0x30b   :  { %v379_v46 = vadd.f32 %v378_v45, %v342_v44 }
 0x30d   :  { %386 = vst.msk [vmem:[#allocation2 + $0x8] sm:$0xff] %vm384_vm2, %v379_v46 }
 0x30e   :  { %400 = dma.vmem_to_hbm [thread:$0]  %s393_s1, 256, %s395_s30, [#allocation3], %s527_s4, %s527_s4, %s528_s8  }
 0x312   :  { %v381_v48 = vpop.f32.mrf.mxu0 }
 0x313   :  { %v382_v49 = vadd.f32 %v381_v48, %v347_v47 }
 0x315   :  { %387 = vst.msk [vmem:[#allocation4] sm:$0xff] %vm384_vm2, %v382_v49 }
 0x316   :  { %411 = dma.vmem_to_hbm [thread:$0]  %s407_s5, 128, %s409_s11, [#allocation5]  }
 0x317   :  { %521 = dma.done.wait [#allocation3], 256  }
 0x318   :  { %522 = vsyncadd [#allocation3], 4294967040 }
 0x319   :  { %523 = dma.done.wait [#allocation5], 128  }
 0x31a   :  { %524 = vsyncadd [#allocation5], 4294967168 }
 0x31b   :  { %420 = vsyncpa [#allocation3], 1 }
 0x31c   :  { %421 = vsyncpa [#allocation5], 1 }

</bundles_post_ra>
